<compile_context>
chip_gen: v5e
topology: v5e:2x2
jax: 0.10.0
libtpu: 0.0.40
codegen_flags: <defaults>
</compile_context>

<pallas_src>
import jax
import jax.numpy as jnp
from jax.experimental import pallas as pl
from jax.experimental.pallas import tpu as pltpu

CHANNELS = 16     # `channels` of AFF (small for the demo)
R = 4             # reduction ratio
INTER = CHANNELS // R
B, H, W = 2, 16, 16
EPS = 1e-5
LANES = 128


def _round8(n):
    return ((n + 7) // 8) * 8


def _param_rows(c, inter):
    """Sublane (row) offsets of each parameter inside the packed slab.

    Every parameter block starts at a multiple-of-8 sublane offset and lane 0,
    so in-kernel static slices are cheaply aligned.
    """
    layout = [("lw1", inter), ("lw2", c), ("gw1", c), ("gw2", c),
              ("lb1", inter), ("lb2", c), ("gb1", 1), ("gb2", c)]
    rows, off = {}, 0
    for name, nrows in layout:
        rows[name] = off
        off += _round8(nrows)
    return rows, off


def pack_params(params, c, inter):
    """Pack the 8 small parameter tensors into one (rows, 128) f32 slab."""
    lw1, lb1, lw2, lb2, gw1, gb1, gw2, gb2 = params
    rows, total = _param_rows(c, inter)
    p = jnp.zeros((total, LANES), jnp.float32)
    p = p.at[rows["lw1"]:rows["lw1"] + inter, 0:c].set(lw1)        # (I, C)
    p = p.at[rows["lw2"]:rows["lw2"] + c, 0:inter].set(lw2)        # (C, I)
    p = p.at[rows["gw1"]:rows["gw1"] + c, 0:inter].set(gw1)        # (C, I) in x out
    p = p.at[rows["gw2"]:rows["gw2"] + c, 0:inter].set(gw2)        # (C, I) out x in
    p = p.at[rows["lb1"]:rows["lb1"] + inter, 0:1].set(lb1)        # (I, 1)
    p = p.at[rows["lb2"]:rows["lb2"] + c, 0:1].set(lb2)            # (C, 1)
    p = p.at[rows["gb1"]:rows["gb1"] + 1, 0:inter].set(gb1)        # (1, I)
    p = p.at[rows["gb2"]:rows["gb2"] + c, 0:1].set(gb2)            # (C, 1)
    return p


# ---------------------------------------------------------------------------
# Pallas kernel: single grid step, channels-first (C, HW) slabs, one packed
# parameter slab, static unrolled batch loop.
# ---------------------------------------------------------------------------
def aff_kernel(x_ref, r_ref, p_ref, xo_ref, x1_ref):
    bn, c, hw = x_ref.shape
    inter = c // R
    inter_p = _round8(inter)          # zero-padded reduction width (aligned)
    rows, _ = _param_rows(c, inter)

    # --- unpack the single packed parameter slab (one DMA; aligned slices) --
    lw1 = p_ref[rows["lw1"]:rows["lw1"] + inter_p, 0:c]            # (8, C)
    lw2 = p_ref[rows["lw2"]:rows["lw2"] + c, 0:inter_p]            # (C, 8)
    gw1 = p_ref[rows["gw1"]:rows["gw1"] + c, 0:inter_p]            # (C, 8) in x out
    gw2 = p_ref[rows["gw2"]:rows["gw2"] + c, 0:inter_p]            # (C, 8) out x in
    lb1 = p_ref[rows["lb1"]:rows["lb1"] + inter_p, 0:1]            # (8, 1)
    lb2 = p_ref[rows["lb2"]:rows["lb2"] + c, 0:1]                  # (C, 1)
    gb1 = p_ref[rows["gb1"]:rows["gb1"] + 1, 0:inter_p]            # (1, 8)
    gb2 = p_ref[rows["gb2"]:rows["gb2"] + c, 0:1]                  # (C, 1)

    # Fully-unrolled static batch loop (B is tiny); each iteration is a pair
    # of rank-2 MXU dots on a lane-dense (C, HW) slab.  The zero padding of
    # the inter dimension contributes nothing (relu(0)=0, zero weight cols).
    for b in range(bn):
        x = x_ref[b]                                               # (C, HW)
        res = r_ref[b]
        xa = x + res

        # local attention: conv1x1 -> BN -> ReLU -> conv1x1 -> BN   (MXU)
        h = jnp.dot(lw1, xa, preferred_element_type=jnp.float32) + lb1
        h = jnp.maximum(h, 0.0)
        xl = jnp.dot(lw2, h, preferred_element_type=jnp.float32) + lb2

        # global attention: AdaptiveAvgPool2d(1) -> same MLP   (VPU/XLU only)
        pooled = jnp.mean(xa, axis=1, keepdims=True)               # (C, 1)
        hg = jnp.sum(gw1 * pooled, axis=0, keepdims=True) + gb1    # (1, 8)
        hg = jnp.maximum(hg, 0.0)
        xg = jnp.sum(gw2 * hg, axis=1, keepdims=True) + gb2        # (C, 1)

        # fusion: factor 2 folded into the sigmoid output, reused twice
        wei2 = 2.0 * jax.nn.sigmoid(xl + xg)                       # (C, HW)
        xo_ref[b] = x * wei2                                       # 2 * x * wei
        x1_ref[b] = res * (2.0 - wei2)                             # 2 * res * (1 - wei)


# ---------------------------------------------------------------------------
# Wrapper: free reshapes (no transposes) + pallas_call (single grid step).
# ---------------------------------------------------------------------------
def aff_forward(x_nchw, res_nchw, params):
    bn, c, hh, ww = x_nchw.shape
    hw = hh * ww
    inter = c // R
    assert c % 8 == 0 and hw % 128 == 0, "demo assumes (8,128)-aligned slabs"

    # NCHW -> (B, C, H*W) is a pure reshape: no data movement.
    x2 = x_nchw.reshape(bn, c, hw)
    r2 = res_nchw.reshape(bn, c, hw)
    packed = pack_params(params, c, inter)
    _, prows = _param_rows(c, inter)

    slab = pl.BlockSpec((bn, c, hw), lambda i: (0, 0, 0))
    xo, x1 = pl.pallas_call(
        aff_kernel,
        out_shape=(jax.ShapeDtypeStruct((bn, c, hw), jnp.float32),
                   jax.ShapeDtypeStruct((bn, c, hw), jnp.float32)),
        grid_spec=pltpu.PrefetchScalarGridSpec(
            num_scalar_prefetch=0,
            grid=(1,),                              # whole problem in one step
            in_specs=[slab, slab,
                      pl.BlockSpec((prows, LANES), lambda i: (0, 0))],
            out_specs=[slab, slab],
        ),
        # Single step -> nothing to shard; if the batch grid is restored for
        # larger shapes, mark it "parallel" to split across v7x's 2 TCs.
        compiler_params=pltpu.CompilerParams(
            dimension_semantics=("arbitrary",)),
    )(x2, r2, packed)

    return xo.reshape(bn, c, hh, ww), x1.reshape(bn, c, hh, ww)


# ---------------------------------------------------------------------------
# Conv1x1 + BatchNorm2d (eval) folding -> (out, in) weight & (out,) bias.
# ---------------------------------------------------------------------------
def fold_conv_bn(w, b, gamma, beta, mean, var, eps=EPS):
    scale = gamma / jnp.sqrt(var + eps)                  # (out,)
    w_f = w * scale[:, None]                             # (out, in)
    b_f = (b - mean) * scale + beta                      # (out,)
    return w_f.astype(jnp.float32), b_f.astype(jnp.float32)


# ---------------------------------------------------------------------------
# Pure-JAX reference (same eval-mode BN folding) for sanity checking.
# ---------------------------------------------------------------------------
def aff_reference(x_nchw, res_nchw, params):
    lw1, lb1, lw2, lb2, gw1, gb1, gw2, gb2 = params
    bn, c, hh, ww = x_nchw.shape
    x2 = x_nchw.reshape(bn, c, hh * ww)
    r2 = res_nchw.reshape(bn, c, hh * ww)
    xa = x2 + r2
    hi = jnp.einsum('ic,bch->bih', lw1, xa,
                    precision=jax.lax.Precision.HIGHEST) + lb1
    hi = jnp.maximum(hi, 0.0)
    xl = jnp.einsum('ci,bih->bch', lw2, hi,
                    precision=jax.lax.Precision.HIGHEST) + lb2
    pooled = jnp.mean(xa, axis=2, keepdims=True)                           # (B, C, 1)
    hg = jnp.maximum(jnp.sum(gw1 * pooled, axis=1, keepdims=True) + gb1, 0.0)  # (B, 1, I)
    xg = jnp.sum(gw2 * hg, axis=2, keepdims=True) + gb2                    # (B, C, 1)
    wei = jax.nn.sigmoid(xl + xg)
    xo = 2.0 * x2 * wei
    x1 = 2.0 * r2 * (1.0 - wei)
    return xo.reshape(x_nchw.shape), x1.reshape(x_nchw.shape)


# ---------------------------------------------------------------------------
# Deterministic parameter construction (matching nn.Module shapes).
# ---------------------------------------------------------------------------
def make_params(key):
    ks = jax.random.split(key, 12)

    def conv_w(k, out_c, in_c):
        # Conv2d weight (out, in, 1, 1) -> (out, in)
        return 0.2 * jax.random.normal(k, (out_c, in_c), jnp.float32)

    def conv_b(k, out_c):
        return 0.1 * jax.random.normal(k, (out_c,), jnp.float32)

    def bn(k, c):
        kg, kb, km, kv = jax.random.split(k, 4)
        gamma = 1.0 + 0.1 * jax.random.normal(kg, (c,), jnp.float32)
        beta = 0.1 * jax.random.normal(kb, (c,), jnp.float32)
        mean = 0.1 * jax.random.normal(km, (c,), jnp.float32)
        var = 0.5 + jnp.abs(jax.random.normal(kv, (c,), jnp.float32))
        return gamma, beta, mean, var

    # local branch: weights in (out, in) orientation for W @ x matmuls.
    lw1, lb1 = fold_conv_bn(conv_w(ks[0], INTER, CHANNELS), conv_b(ks[1], INTER),
                            *bn(ks[2], INTER))          # (INTER, C), (INTER,)
    lw2, lb2 = fold_conv_bn(conv_w(ks[3], CHANNELS, INTER), conv_b(ks[4], CHANNELS),
                            *bn(ks[5], CHANNELS))       # (C, INTER), (C,)
    lb1 = lb1.reshape(INTER, 1)
    lb2 = lb2.reshape(CHANNELS, 1)

    # global branch: shapes chosen for the VPU broadcast-reduce formulation.
    gw1, gb1 = fold_conv_bn(conv_w(ks[6], INTER, CHANNELS), conv_b(ks[7], INTER),
                            *bn(ks[8], INTER))          # (INTER, C), (INTER,)
    gw2, gb2 = fold_conv_bn(conv_w(ks[9], CHANNELS, INTER), conv_b(ks[10], CHANNELS),
                            *bn(ks[11], CHANNELS))      # (C, INTER), (C,)
    gw1 = gw1.T                                         # (C, INTER): in x out
    gb1 = gb1.reshape(1, INTER)
    gb2 = gb2.reshape(CHANNELS, 1)

    return (lw1, lb1, lw2, lb2, gw1, gb1, gw2, gb2)


if __name__ == "__main__":
    key = jax.random.PRNGKey(0)
    k_x, k_r, k_p = jax.random.split(key, 3)
    x = jax.random.normal(k_x, (B, CHANNELS, H, W), jnp.float32)
    residual = jax.random.normal(k_r, (B, CHANNELS, H, W), jnp.float32)
    params = make_params(k_p)

    xo, x1 = jax.jit(aff_forward)(x, residual, params)
    jax.block_until_ready((xo, x1))

    xo_ref, x1_ref = aff_reference(x, residual, params)
    # tolerance allows for MXU f32 multi-pass accumulation-order differences
    assert jnp.allclose(xo, xo_ref, atol=2e-3, rtol=2e-3)
    assert jnp.allclose(x1, x1_ref, atol=2e-3, rtol=2e-3)

    print("KERNEL_OK")
</pallas_src>

<mosaic_0001>
module attributes {stable_mosaic.version = 11 : i64} {
  func.func @aff_kernel(%arg0: i32, %arg1: memref<2x16x256xf32, #tpu.memory_space<vmem>>, %arg2: memref<2x16x256xf32, #tpu.memory_space<vmem>>, %arg3: memref<104x128xf32, #tpu.memory_space<vmem>>, %arg4: memref<2x16x256xf32, #tpu.memory_space<vmem>>, %arg5: memref<2x16x256xf32, #tpu.memory_space<vmem>>) attributes {dimension_semantics = [#tpu.dimension_semantics<arbitrary>], iteration_bounds = array<i64: 1>, scalar_prefetch = 0 : i64, scratch_operands = 0 : i64, tpu.core_type = #tpu.core_type<tc>, window_params = [{pipeline_mode = #tpu.pipeline_mode<synchronous>, transform_indices = @transform_0, window_bounds = array<i64: 2, 16, 256>}, {pipeline_mode = #tpu.pipeline_mode<synchronous>, transform_indices = @transform_1, window_bounds = array<i64: 2, 16, 256>}, {pipeline_mode = #tpu.pipeline_mode<synchronous>, transform_indices = @transform_2, window_bounds = array<i64: 104, 128>}, {pipeline_mode = #tpu.pipeline_mode<synchronous>, transform_indices = @transform_3, window_bounds = array<i64: 2, 16, 256>}, {pipeline_mode = #tpu.pipeline_mode<synchronous>, transform_indices = @transform_4, window_bounds = array<i64: 2, 16, 256>}]} {
    %c0 = arith.constant 0 : index
    %c0_0 = arith.constant 0 : index
    %0 = vector.load %arg3[%c0, %c0_0] : memref<104x128xf32, #tpu.memory_space<vmem>>, vector<8x16xf32>
    %c8 = arith.constant 8 : index
    %c0_1 = arith.constant 0 : index
    %1 = vector.load %arg3[%c8, %c0_1] : memref<104x128xf32, #tpu.memory_space<vmem>>, vector<16x8xf32>
    %c24 = arith.constant 24 : index
    %c0_2 = arith.constant 0 : index
    %2 = vector.load %arg3[%c24, %c0_2] : memref<104x128xf32, #tpu.memory_space<vmem>>, vector<16x8xf32>
    %c40 = arith.constant 40 : index
    %c0_3 = arith.constant 0 : index
    %3 = vector.load %arg3[%c40, %c0_3] : memref<104x128xf32, #tpu.memory_space<vmem>>, vector<16x8xf32>
    %c56 = arith.constant 56 : index
    %c0_4 = arith.constant 0 : index
    %4 = vector.load %arg3[%c56, %c0_4] : memref<104x128xf32, #tpu.memory_space<vmem>>, vector<8x1xf32>
    %c64 = arith.constant 64 : index
    %c0_5 = arith.constant 0 : index
    %5 = vector.load %arg3[%c64, %c0_5] : memref<104x128xf32, #tpu.memory_space<vmem>>, vector<16x1xf32>
    %c80 = arith.constant 80 : index
    %c0_6 = arith.constant 0 : index
    %6 = vector.load %arg3[%c80, %c0_6] : memref<104x128xf32, #tpu.memory_space<vmem>>, vector<1x8xf32>
    %c88 = arith.constant 88 : index
    %c0_7 = arith.constant 0 : index
    %7 = vector.load %arg3[%c88, %c0_7] : memref<104x128xf32, #tpu.memory_space<vmem>>, vector<16x1xf32>
    %c0_8 = arith.constant 0 : index
    %c0_9 = arith.constant 0 : index
    %c0_10 = arith.constant 0 : index
    %8 = vector.load %arg1[%c0_8, %c0_9, %c0_10] : memref<2x16x256xf32, #tpu.memory_space<vmem>>, vector<1x16x256xf32>
    %9 = vector.shape_cast %8 : vector<1x16x256xf32> to vector<16x256xf32>
    %c0_11 = arith.constant 0 : index
    %c0_12 = arith.constant 0 : index
    %c0_13 = arith.constant 0 : index
    %10 = vector.load %arg2[%c0_11, %c0_12, %c0_13] : memref<2x16x256xf32, #tpu.memory_space<vmem>>, vector<1x16x256xf32>
    %11 = vector.shape_cast %10 : vector<1x16x256xf32> to vector<16x256xf32>
    %12 = arith.addf %9, %11 : vector<16x256xf32>
    %cst = arith.constant dense<0.000000e+00> : vector<8x256xf32>
    %13 = tpu.matmul %0, %12, %cst {dimension_numbers = #tpu.dot_dimension_numbers<[1], [0], [0], [1], [0, 0, 1, 1], [], []>} : vector<8x16xf32>, vector<16x256xf32>, vector<8x256xf32> -> vector<8x256xf32>
    %14 = vector.broadcast %4 : vector<8x1xf32> to vector<8x256xf32>
    %15 = arith.addf %13, %14 : vector<8x256xf32>
    %cst_14 = arith.constant 0.000000e+00 : f32
    %16 = vector.broadcast %cst_14 : f32 to vector<8x256xf32>
    %17 = arith.maximumf %15, %16 : vector<8x256xf32>
    %cst_15 = arith.constant dense<0.000000e+00> : vector<16x256xf32>
    %18 = tpu.matmul %1, %17, %cst_15 {dimension_numbers = #tpu.dot_dimension_numbers<[1], [0], [0], [1], [0, 0, 1, 1], [], []>} : vector<16x8xf32>, vector<8x256xf32>, vector<16x256xf32> -> vector<16x256xf32>
    %19 = vector.broadcast %5 : vector<16x1xf32> to vector<16x256xf32>
    %20 = arith.addf %18, %19 : vector<16x256xf32>
    %cst_16 = arith.constant dense<0.000000e+00> : vector<16xf32>
    %21 = vector.multi_reduction <add>, %12, %cst_16 [1] : vector<16x256xf32> to vector<16xf32>
    %22 = vector.shape_cast %21 : vector<16xf32> to vector<16x1xf32>
    %cst_17 = arith.constant 2.560000e+02 : f32
    %23 = vector.broadcast %cst_17 : f32 to vector<16x1xf32>
    %24 = arith.divf %22, %23 : vector<16x1xf32>
    %25 = vector.broadcast %24 : vector<16x1xf32> to vector<16x8xf32>
    %26 = arith.mulf %2, %25 : vector<16x8xf32>
    %cst_18 = arith.constant dense<0.000000e+00> : vector<8xf32>
    %27 = vector.multi_reduction <add>, %26, %cst_18 [0] : vector<16x8xf32> to vector<8xf32>
    %28 = vector.shape_cast %27 : vector<8xf32> to vector<1x8xf32>
    %29 = arith.addf %28, %6 : vector<1x8xf32>
    %cst_19 = arith.constant 0.000000e+00 : f32
    %30 = vector.broadcast %cst_19 : f32 to vector<1x8xf32>
    %31 = arith.maximumf %29, %30 : vector<1x8xf32>
    %32 = vector.broadcast %31 : vector<1x8xf32> to vector<16x8xf32>
    %33 = arith.mulf %3, %32 : vector<16x8xf32>
    %cst_20 = arith.constant dense<0.000000e+00> : vector<16xf32>
    %34 = vector.multi_reduction <add>, %33, %cst_20 [1] : vector<16x8xf32> to vector<16xf32>
    %35 = vector.shape_cast %34 : vector<16xf32> to vector<16x1xf32>
    %36 = arith.addf %35, %7 : vector<16x1xf32>
    %37 = vector.broadcast %36 : vector<16x1xf32> to vector<16x256xf32>
    %38 = arith.addf %20, %37 : vector<16x256xf32>
    %39 = arith.negf %38 : vector<16x256xf32>
    %40 = math.exp %39 : vector<16x256xf32>
    %cst_21 = arith.constant 1.000000e+00 : f32
    %41 = vector.broadcast %cst_21 : f32 to vector<16x256xf32>
    %42 = arith.addf %41, %40 : vector<16x256xf32>
    %43 = arith.divf %41, %42 : vector<16x256xf32>
    %cst_22 = arith.constant 2.000000e+00 : f32
    %44 = vector.broadcast %cst_22 : f32 to vector<16x256xf32>
    %45 = arith.mulf %44, %43 : vector<16x256xf32>
    %46 = arith.mulf %9, %45 : vector<16x256xf32>
    %c0_23 = arith.constant 0 : index
    %c0_24 = arith.constant 0 : index
    %c0_25 = arith.constant 0 : index
    %47 = vector.load %arg4[%c0_23, %c0_24, %c0_25] : memref<2x16x256xf32, #tpu.memory_space<vmem>>, vector<1x16x256xf32>
    %48 = vector.shape_cast %47 : vector<1x16x256xf32> to vector<16x256xf32>
    %49 = vector.shape_cast %46 : vector<16x256xf32> to vector<1x16x256xf32>
    tpu.vector_store %arg4[%c0_23, %c0_24, %c0_25], %49 {strides = array<i32>} : memref<2x16x256xf32, #tpu.memory_space<vmem>>, vector<1x16x256xf32>,
    %cst_26 = arith.constant 2.000000e+00 : f32
    %50 = vector.broadcast %cst_26 : f32 to vector<16x256xf32>
    %51 = arith.subf %50, %45 : vector<16x256xf32>
    %52 = arith.mulf %11, %51 : vector<16x256xf32>
    %c0_27 = arith.constant 0 : index
    %c0_28 = arith.constant 0 : index
    %c0_29 = arith.constant 0 : index
    %53 = vector.load %arg5[%c0_27, %c0_28, %c0_29] : memref<2x16x256xf32, #tpu.memory_space<vmem>>, vector<1x16x256xf32>
    %54 = vector.shape_cast %53 : vector<1x16x256xf32> to vector<16x256xf32>
    %55 = vector.shape_cast %52 : vector<16x256xf32> to vector<1x16x256xf32>
    tpu.vector_store %arg5[%c0_27, %c0_28, %c0_29], %55 {strides = array<i32>} : memref<2x16x256xf32, #tpu.memory_space<vmem>>, vector<1x16x256xf32>,
    %c1 = arith.constant 1 : index
    %c0_30 = arith.constant 0 : index
    %c0_31 = arith.constant 0 : index
    %56 = vector.load %arg1[%c1, %c0_30, %c0_31] : memref<2x16x256xf32, #tpu.memory_space<vmem>>, vector<1x16x256xf32>
    %57 = vector.shape_cast %56 : vector<1x16x256xf32> to vector<16x256xf32>
    %c1_32 = arith.constant 1 : index
    %c0_33 = arith.constant 0 : index
    %c0_34 = arith.constant 0 : index
    %58 = vector.load %arg2[%c1_32, %c0_33, %c0_34] : memref<2x16x256xf32, #tpu.memory_space<vmem>>, vector<1x16x256xf32>
    %59 = vector.shape_cast %58 : vector<1x16x256xf32> to vector<16x256xf32>
    %60 = arith.addf %57, %59 : vector<16x256xf32>
    %cst_35 = arith.constant dense<0.000000e+00> : vector<8x256xf32>
    %61 = tpu.matmul %0, %60, %cst_35 {dimension_numbers = #tpu.dot_dimension_numbers<[1], [0], [0], [1], [0, 0, 1, 1], [], []>} : vector<8x16xf32>, vector<16x256xf32>, vector<8x256xf32> -> vector<8x256xf32>
    %62 = vector.broadcast %4 : vector<8x1xf32> to vector<8x256xf32>
    %63 = arith.addf %61, %62 : vector<8x256xf32>
    %cst_36 = arith.constant 0.000000e+00 : f32
    %64 = vector.broadcast %cst_36 : f32 to vector<8x256xf32>
    %65 = arith.maximumf %63, %64 : vector<8x256xf32>
    %cst_37 = arith.constant dense<0.000000e+00> : vector<16x256xf32>
    %66 = tpu.matmul %1, %65, %cst_37 {dimension_numbers = #tpu.dot_dimension_numbers<[1], [0], [0], [1], [0, 0, 1, 1], [], []>} : vector<16x8xf32>, vector<8x256xf32>, vector<16x256xf32> -> vector<16x256xf32>
    %67 = vector.broadcast %5 : vector<16x1xf32> to vector<16x256xf32>
    %68 = arith.addf %66, %67 : vector<16x256xf32>
    %cst_38 = arith.constant dense<0.000000e+00> : vector<16xf32>
    %69 = vector.multi_reduction <add>, %60, %cst_38 [1] : vector<16x256xf32> to vector<16xf32>
    %70 = vector.shape_cast %69 : vector<16xf32> to vector<16x1xf32>
    %cst_39 = arith.constant 2.560000e+02 : f32
    %71 = vector.broadcast %cst_39 : f32 to vector<16x1xf32>
    %72 = arith.divf %70, %71 : vector<16x1xf32>
    %73 = vector.broadcast %72 : vector<16x1xf32> to vector<16x8xf32>
    %74 = arith.mulf %2, %73 : vector<16x8xf32>
    %cst_40 = arith.constant dense<0.000000e+00> : vector<8xf32>
    %75 = vector.multi_reduction <add>, %74, %cst_40 [0] : vector<16x8xf32> to vector<8xf32>
    %76 = vector.shape_cast %75 : vector<8xf32> to vector<1x8xf32>
    %77 = arith.addf %76, %6 : vector<1x8xf32>
    %cst_41 = arith.constant 0.000000e+00 : f32
    %78 = vector.broadcast %cst_41 : f32 to vector<1x8xf32>
    %79 = arith.maximumf %77, %78 : vector<1x8xf32>
    %80 = vector.broadcast %79 : vector<1x8xf32> to vector<16x8xf32>
    %81 = arith.mulf %3, %80 : vector<16x8xf32>
    %cst_42 = arith.constant dense<0.000000e+00> : vector<16xf32>
    %82 = vector.multi_reduction <add>, %81, %cst_42 [1] : vector<16x8xf32> to vector<16xf32>
    %83 = vector.shape_cast %82 : vector<16xf32> to vector<16x1xf32>
    %84 = arith.addf %83, %7 : vector<16x1xf32>
    %85 = vector.broadcast %84 : vector<16x1xf32> to vector<16x256xf32>
    %86 = arith.addf %68, %85 : vector<16x256xf32>
    %87 = arith.negf %86 : vector<16x256xf32>
    %88 = math.exp %87 : vector<16x256xf32>
    %cst_43 = arith.constant 1.000000e+00 : f32
    %89 = vector.broadcast %cst_43 : f32 to vector<16x256xf32>
    %90 = arith.addf %89, %88 : vector<16x256xf32>
    %91 = arith.divf %89, %90 : vector<16x256xf32>
    %cst_44 = arith.constant 2.000000e+00 : f32
    %92 = vector.broadcast %cst_44 : f32 to vector<16x256xf32>
    %93 = arith.mulf %92, %91 : vector<16x256xf32>
    %94 = arith.mulf %57, %93 : vector<16x256xf32>
    %c1_45 = arith.constant 1 : index
    %c0_46 = arith.constant 0 : index
    %c0_47 = arith.constant 0 : index
    %95 = vector.load %arg4[%c1_45, %c0_46, %c0_47] : memref<2x16x256xf32, #tpu.memory_space<vmem>>, vector<1x16x256xf32>
    %96 = vector.shape_cast %95 : vector<1x16x256xf32> to vector<16x256xf32>
    %97 = vector.shape_cast %94 : vector<16x256xf32> to vector<1x16x256xf32>
    tpu.vector_store %arg4[%c1_45, %c0_46, %c0_47], %97 {strides = array<i32>} : memref<2x16x256xf32, #tpu.memory_space<vmem>>, vector<1x16x256xf32>,
    %cst_48 = arith.constant 2.000000e+00 : f32
    %98 = vector.broadcast %cst_48 : f32 to vector<16x256xf32>
    %99 = arith.subf %98, %93 : vector<16x256xf32>
    %100 = arith.mulf %59, %99 : vector<16x256xf32>
    %c1_49 = arith.constant 1 : index
    %c0_50 = arith.constant 0 : index
    %c0_51 = arith.constant 0 : index
    %101 = vector.load %arg5[%c1_49, %c0_50, %c0_51] : memref<2x16x256xf32, #tpu.memory_space<vmem>>, vector<1x16x256xf32>
    %102 = vector.shape_cast %101 : vector<1x16x256xf32> to vector<16x256xf32>
    %103 = vector.shape_cast %100 : vector<16x256xf32> to vector<1x16x256xf32>
    tpu.vector_store %arg5[%c1_49, %c0_50, %c0_51], %103 {strides = array<i32>} : memref<2x16x256xf32, #tpu.memory_space<vmem>>, vector<1x16x256xf32>,
    return
  }
  func.func @transform_0(%arg0: i32) -> (i32, i32, i32) {
    %c0_i32 = arith.constant 0 : i32
    %c0_i32_0 = arith.constant 0 : i32
    %c0_i32_1 = arith.constant 0 : i32
    %c0_i32_2 = arith.constant 0 : i32
    return %c0_i32, %c0_i32_0, %c0_i32_1 : i32, i32, i32
  }
  func.func @transform_1(%arg0: i32) -> (i32, i32, i32) {
    %c0_i32 = arith.constant 0 : i32
    %c0_i32_0 = arith.constant 0 : i32
    %c0_i32_1 = arith.constant 0 : i32
    %c0_i32_2 = arith.constant 0 : i32
    return %c0_i32, %c0_i32_0, %c0_i32_1 : i32, i32, i32
  }
  func.func @transform_2(%arg0: i32) -> (i32, i32) {
    %c0_i32 = arith.constant 0 : i32
    %c0_i32_0 = arith.constant 0 : i32
    %c0_i32_1 = arith.constant 0 : i32
    return %c0_i32, %c0_i32_0 : i32, i32
  }
  func.func @transform_3(%arg0: i32) -> (i32, i32, i32) {
    %c0_i32 = arith.constant 0 : i32
    %c0_i32_0 = arith.constant 0 : i32
    %c0_i32_1 = arith.constant 0 : i32
    %c0_i32_2 = arith.constant 0 : i32
    return %c0_i32, %c0_i32_0, %c0_i32_1 : i32, i32, i32
  }
  func.func @transform_4(%arg0: i32) -> (i32, i32, i32) {
    %c0_i32 = arith.constant 0 : i32
    %c0_i32_0 = arith.constant 0 : i32
    %c0_i32_1 = arith.constant 0 : i32
    %c0_i32_2 = arith.constant 0 : i32
    return %c0_i32, %c0_i32_0, %c0_i32_1 : i32, i32, i32
  }
}

</mosaic_0001>

<bundles_post_ra>
// kernel: aff_forward.1
= control target key start
LH: loop header
LB: loop body
LE: loop exit
PB: predicated region body
PF: predicated region fallthrough
CT: control target
= control target key end

     0   :  { %v643_v0 = vmov 0   ;;  %vm46_vm0 = vcmask 130048   ;;  %v644_v32 = vmov 256.0   ;;  %vm102_vm1 = vcmask 64512   ;;  %s959_s2 = inlined_call_operand.vmem [shape: f32[104,128], index: 2, kind: input, shape index: {}]   ;;  %s960_s0 = inlined_call_operand.vmem [shape: f32[2,16,256], index: 0, kind: input, shape index: {}]   ;;  %s961_s1 = inlined_call_operand.vmem [shape: f32[2,16,256], index: 1, kind: input, shape index: {}]   ;;  %s962_s3 = inlined_call_operand.vmem [shape: f32[2,16,256], index: 3, kind: output, shape index: {0}]   ;;  %s963_s4 = inlined_call_operand.vmem [shape: f32[2,16,256], index: 4, kind: output, shape index: {1}]  }
   0x1   :  { %606 = vset.pattern.permute.xlu0 %v643_v0  ;;  %v23_v1 = vld [vmem:[%s959_s2 + $0x38] sm:$0xff]  ;;  %v676_v2 = vld [vmem:[%s960_s0 + $0x10] sm:$0xff]  ;;  %608 = vset.pattern.permute.xlu1 %v643_v0  ;;  %v698_v7 = vld [vmem:[%s960_s0] sm:$0xff]  ;;  %609 = vrcp.f32 %v644_v32 }
   0x2   :  { %v681_v3 = vld [vmem:[%s961_s1 + $0x10] sm:$0xff]  ;;  %43 = vperm.xlu0 %606, %v23_v1   ;;  %v688_v5 = vld [vmem:[%s960_s0 + $0x18] sm:$0xff]  ;;  %607 = vset.pattern.permute.xlu2 %v643_v0  ;;  %v705_v9 = vld [vmem:[%s961_s1] sm:$0xff] }
   0x3   :  { %v39_v4 = vadd.f32 %v681_v3, %v676_v2  ;;  %v693_v6 = vld [vmem:[%s961_s1 + $0x18] sm:$0xff]  ;;  %v710_v10 = vld [vmem:[%s960_s0 + $0x8] sm:$0xff]  ;;  %v37_v12 = vadd.f32 %v705_v9, %v698_v7  ;;  %v724_v14 = vld [vmem:[%s959_s2] sm:$0xff] }
   0x4   :  { %v40_v8 = vadd.f32 %v693_v6, %v688_v5  ;;  %v715_v11 = vld [vmem:[%s961_s1 + $0x8] sm:$0xff]  ;;  %v733_v16 = vld [vmem:[%s960_s0 + $0x30] sm:$0xff]  ;;  %v738_v17 = vld [vmem:[%s960_s0 + $0x38] sm:$0xff] }
   0x5   :  { %64 = vmatpush.msra.mxu0 %v39_v4  ;;  %v38_v13 = vadd.f32 %v715_v11, %v710_v10  ;;  %v743_v18 = vld [vmem:[%s961_s1 + $0x30] sm:$0xff]  ;;  %v748_v19 = vld [vmem:[%s961_s1 + $0x38] sm:$0xff]  ;;  %v755_v21 = vld [vmem:[%s960_s0 + $0x20] sm:$0xff] }
   0x6   :  { %84 = vmatpush.msra.mxu1 %v40_v8  ;;  %v158_v15 = vadd.f32 %v40_v8, %v39_v4  ;;  %v320_v20 = vadd.f32 %v743_v18, %v733_v16  ;;  %v760_v22 = vld [vmem:[%s960_s0 + $0x28] sm:$0xff]  ;;  %v321_v23 = vadd.f32 %v748_v19, %v738_v17  ;;  %v767_v24 = vld [vmem:[%s961_s1 + $0x20] sm:$0xff]  ;;  %v796_v48 = vld [vmem:[%s959_s2 + $0x10] sm:$0xff] }
   0x7   :  { %65 = vmatpush.msra.mxu0 %v37_v12  ;;  %v772_v25 = vld [vmem:[%s961_s1 + $0x28] sm:$0xff]  ;;  %v318_v26 = vadd.f32 %v767_v24, %v755_v21  ;;  %v155_v30 = vadd.f32 %v38_v13, %v37_v12  ;;  %v24_v33 = vld [vmem:[%s959_s2 + $0x40] sm:$0xff]  ;;  %v610_v34 = vpop.eup %609  ;;  %v19_v55 = vld [vmem:[%s959_s2 + $0x18] sm:$0xff] }
   0x8   :  { %85 = vmatpush.msra.mxu1 %v38_v13  ;;  %566 = vmatmul.msk.f32.vlgmr.msra.gmra.mxu0 %vm46_vm0, %v724_v14  ;;  %v319_v27 = vadd.f32 %v772_v25, %v760_v22  ;;  %v413_v28 = vadd.f32 %v321_v23, %v320_v20  ;;  %v25_v31 = vld [vmem:[%s959_s2 + $0x48] sm:$0xff]  ;;  %v162_v35 = vmul.f32 256.0, %v610_v34  ;;  %vm166_vm2 = vweird.f32 %v610_v34  ;;  %v20_v54 = vld [vmem:[%s959_s2 + $0x20] sm:$0xff]  ;;  %v26_v32 = vld [vmem:[%s959_s2 + $0x50] sm:$0x1] }
   0x9   :  { %567 = vmatmul.msk.f32.vlgmr.msra.gmra.mxu1 %vm46_vm0, %v724_v14  ;;  %159 = vadd.xlane.f32.xlu1 %v158_v15  ;;  %v791_v47 = vld [vmem:[%s959_s2 + $0x8] sm:$0xff] }
   0xa   :  { %v410_v29 = vadd.f32 %v319_v27, %v318_v26  ;;  %414 = vadd.xlane.f32.xlu2 %v413_v28  ;;  %v163_v36 = vsub.f32 1.0, %v162_v35 }
   0xc   :  { %v164_v38 = vmul.f32 %v610_v34, %v163_v36 }
   0xe   :  { %v165_v45 = vadd.f32 %v610_v34, %v164_v38  ;;  %v21_v38 = vld [vmem:[%s959_s2 + $0x28] sm:$0xff] }
  0x10   :  { %v167_v51 = vsel %vm166_vm2, %v610_v34, %v165_v45 }
  0x11   :  { %411 = vadd.xlane.f32.xlu1 %v410_v29 }
  0x22   :  { %94 = vperm.xlu2 %607, %v24_v33  }
  0x2a   :  { %99 = vperm.xlu1 %608, %v25_v31  }
  0x2c   :  { %156 = vadd.xlane.f32.xlu0 %v155_v30 }
  0x74   :  { %v784_v39 = vpop.permute.xlu0 %43 }
  0x7c   :  { %v160_v37 = vpop.xlane.xlu1 %159 }
  0x7d   :  { %v415_v49 = vpop.xlane.xlu2 %414  ;;  %v169_v61 = vmul.f32 %v167_v51, %v160_v37  ;;  %v22_v37 = vld [vmem:[%s959_s2 + $0x30] sm:$0xff] }
  0x7e   :  { %v417_v52 = vmul.f32 %v415_v49, %v167_v51 }
  0x7f   :  { %v171_v63 = vmul.f32 %v169_v61, %v20_v54 }
  0x80   :  { %v419_v56 = vmul.f32 %v417_v52, %v20_v54 }
  0x81   :  { %v173_v8 = vsel %vm102_vm1, %v171_v63, 0.0  ;;  %v27_v63 = vld [vmem:[%s959_s2 + $0x58] sm:$0xff] }
  0x82   :  { %v421_v58 = vsel %vm102_vm1, %v419_v56, 0.0 }
  0x84   :  { %v412_v50 = vpop.xlane.xlu1 %411 }
  0x85   :  { %v67_v40 = vpop.f32.mrf.mxu0  ;;  %v416_v53 = vmul.f32 %v412_v50, %v167_v51 }
  0x86   :  { %v68_v41 = vadd.f32 %v67_v40, %v784_v39  ;;  %v87_v42 = vpop.f32.mrf.mxu1 }
  0x87   :  { %v88_v43 = vadd.f32 %v87_v42, %v784_v39  ;;  %v418_v57 = vmul.f32 %v416_v53, %v19_v55 }
  0x88   :  { %v90_v44 = vmax.f32 %v68_v41, 0.0 }
  0x89   :  { %v91_v46 = vmax.f32 %v88_v43, 0.0  ;;  %v420_v59 = vsel %vm102_vm1, %v418_v57, 0.0 }
  0x8a   :  { %124 = vmatpush.msrb.mxu0 %v90_v44  ;;  %602 = vmatpush.msra.mxu2 %v90_v44  ;;  %v422_v60 = vadd.f32 %v421_v58, %v420_v59 }
  0x8b   :  { %147 = vmatpush.msrb.mxu1 %v91_v46  ;;  %603 = vmatpush.msra.mxu3 %v91_v46 }
  0x8c   :  { %568 = vmatmul.msk.f32.vlgmr.msrb.gmra.mxu0 %vm102_vm1, %v791_v47  ;;  %569 = vmatmul.msk.f32.vlgmr.msra.gmra.mxu2 %vm102_vm1, %v796_v48  ;;  %v423_v62 = vrot.slane %v422_v60, 4 }
  0x8d   :  { %570 = vmatmul.msk.f32.vlgmr.msrb.gmra.mxu1 %vm102_vm1, %v791_v47  ;;  %571 = vmatmul.msk.f32.vlgmr.msra.gmra.mxu3 %vm102_vm1, %v796_v48 }
  0x8e   :  { %336 = vmatpush.msra.mxu0 %v320_v20  ;;  %356 = vmatpush.msra.mxu1 %v321_v23  ;;  %v424_v1 = vadd.f32 %v423_v62, %v422_v60  ;;  %v95_v62 = vpop.permute.xlu2 %94 }
  0x90   :  { %337 = vmatpush.msra.mxu0 %v318_v26  ;;  %357 = vmatpush.msra.mxu1 %v319_v27  ;;  %v425_v13 = vrot.slane %v424_v1, 2 }
  0x94   :  { %584 = vmatmul.msk.f32.vlgmr.msra.gmra.mxu0 %vm46_vm0, %v724_v14 }
  0x95   :  { %585 = vmatmul.msk.f32.vlgmr.msra.gmra.mxu1 %vm46_vm0, %v724_v14  ;;  %v426_v14 = vadd.f32 %v425_v13, %v424_v1 }
  0x97   :  { %v427_v28 = vrot.slane %v426_v14, 1 }
  0x99   :  { %v428_v31 = vadd.f32 %v427_v28, %v426_v14 }
  0x9b   :  { %v429_v35 = vadd.f32 %v428_v31, %v26_v32 }
  0x9c   :  { %v843_v61 = vpop.permute.xlu1 %99 }
  0x9d   :  { %v430_v41 = vmax.f32 %v429_v35, 0.0 }
  0x9f   :  { %v157_v0 = vpop.xlane.xlu0 %156  ;;  %v431_v46 = vperm.slane %v430_v41, 0 }
  0xa0   :  { %v168_v4 = vmul.f32 %v167_v51, %v157_v0 }
  0xa1   :  { %v433_v49 = vmul.f32 %v431_v46, %v22_v37  ;;  %v432_v50 = vmul.f32 %v431_v46, %v21_v38 }
  0xa2   :  { %v170_v12 = vmul.f32 %v168_v4, %v19_v55 }
  0xa3   :  { %v437_v51 = vsel %vm102_vm1, %v433_v49, 0.0  ;;  %v434_v52 = vsel %vm102_vm1, %v432_v50, 0.0 }
  0xa4   :  { %v172_v15 = vsel %vm102_vm1, %v170_v12, 0.0 }
  0xa5   :  { %v174_v20 = vadd.f32 %v173_v8, %v172_v15 }
  0xa7   :  { %v175_v23 = vrot.slane %v174_v20, 4 }
  0xa9   :  { %v176_v26 = vadd.f32 %v175_v23, %v174_v20 }
  0xab   :  { %v177_v27 = vrot.slane %v176_v26, 2 }
  0xad   :  { %v178_v29 = vadd.f32 %v177_v27, %v176_v26 }
  0xaf   :  { %v179_v30 = vrot.slane %v178_v29, 1 }
  0xb1   :  { %v180_v33 = vadd.f32 %v179_v30, %v178_v29 }
  0xb3   :  { %v181_v34 = vadd.f32 %v180_v33, %v26_v32 }
  0xb5   :  { %v182_v36 = vmax.f32 %v181_v34, 0.0 }
  0xb7   :  { %v183_v40 = vperm.slane %v182_v36, 0 }
  0xb9   :  { %v185_v42 = vmul.f32 %v183_v40, %v22_v37  ;;  %v184_v43 = vmul.f32 %v183_v40, %v21_v38 }
  0xbb   :  { %v189_v44 = vsel %vm102_vm1, %v185_v42, 0.0  ;;  %v186_v45 = vsel %vm102_vm1, %v184_v43, 0.0 }
  0xbc   :  { %190 = vadd.xlane.f32.xlu1 %v189_v44  ;;  %187 = vadd.xlane.f32.xlu2 %v186_v45 }
  0xc4   :  { %438 = vadd.xlane.f32.xlu1 %v437_v51  ;;  %435 = vadd.xlane.f32.xlu2 %v434_v52 }
 0x109   :  { %v126_v53 = vpop.f32.mrf.mxu0 }
 0x10a   :  { %v149_v54 = vpop.f32.mrf.mxu1  ;;  %v127_v15 = vadd.f32 %v126_v53, %v95_v62 }
 0x10b   :  { %v150_v20 = vadd.f32 %v149_v54, %v95_v62 }
 0x10f   :  { %v129_v29 = vpop.f32.mrf.mxu2 }
 0x110   :  { %v152_v30 = vpop.f32.mrf.mxu3  ;;  %v130_v50 = vadd.f32 %v129_v29, %v843_v61 }
 0x111   :  { %v339_v55 = vpop.f32.mrf.mxu0  ;;  %v153_v52 = vadd.f32 %v152_v30, %v843_v61 }
 0x112   :  { %v340_v56 = vadd.f32 %v339_v55, %v784_v39  ;;  %v359_v57 = vpop.f32.mrf.mxu1 }
 0x113   :  { %v360_v58 = vadd.f32 %v359_v57, %v784_v39  ;;  %v28_v39 = vld [vmem:[%s959_s2 + $0x60] sm:$0xff] }
 0x114   :  { %v362_v59 = vmax.f32 %v340_v56, 0.0 }
 0x115   :  { %v363_v60 = vmax.f32 %v360_v58, 0.0 }
 0x116   :  { %379 = vmatpush.msrb.mxu2 %v362_v59 }
 0x117   :  { %402 = vmatpush.msrb.mxu3 %v363_v60  ;;  %586 = vmatmul.msk.f32.vlgmr.msrb.gmra.mxu2 %vm102_vm1, %v791_v47 }
 0x118   :  { %588 = vmatmul.msk.f32.vlgmr.msrb.gmra.mxu3 %vm102_vm1, %v791_v47 }
 0x11f   :  { %587 = vmatmul.msk.f32.gmra.mxu2 %vm102_vm1, %v796_v48 }
 0x120   :  { %589 = vmatmul.msk.f32.gmra.mxu3 %vm102_vm1, %v796_v48 }
 0x12f   :  { %v191_v0 = vpop.xlane.xlu1 %190  ;;  %v188_v1 = vpop.xlane.xlu2 %187 }
 0x130   :  { %v193_v47 = vadd.f32 %v191_v0, %v28_v39  ;;  %v192_v4 = vadd.f32 %v188_v1, %v27_v63 }
 0x132   :  { %201 = vperm.xlu0 %606, %v193_v47   ;;  %196 = vperm.xlu2 %607, %v192_v4  }
 0x137   :  { %v439_v8 = vpop.xlane.xlu1 %438  ;;  %v436_v12 = vpop.xlane.xlu2 %435 }
 0x138   :  { %v441_v48 = vadd.f32 %v439_v8, %v28_v39  ;;  %v440_v13 = vadd.f32 %v436_v12, %v27_v63 }
 0x13a   :  { %449 = vperm.xlu1 %608, %v441_v48   ;;  %444 = vperm.xlu2 %607, %v440_v13  }
 0x18c   :  { %v197_v23 = vpop.permute.xlu2 %196 }
 0x18d   :  { %v204_v14 = vadd.f32 %v197_v23, %v127_v15  ;;  %v205_v26 = vadd.f32 %v197_v23, %v150_v20 }
 0x18f   :  { %v572_v27 = vmul.f32 -1.442695, %v204_v14  ;;  %v573_v28 = vmul.f32 -1.442695, %v205_v26 }
 0x191   :  { %611 = vpow2.f32 %v572_v27 }
 0x192   :  { %613 = vpow2.f32 %v573_v28 }
 0x194   :  { %v445_v40 = vpop.permute.xlu2 %444 }
 0x197   :  { %v612_v31 = vpop.eup %611 }
 0x198   :  { %v614_v32 = vpop.eup %613  ;;  %v220_v33 = vadd.f32 1.0, %v612_v31 }
 0x199   :  { %v221_v34 = vadd.f32 1.0, %v614_v32 }
 0x19a   :  { %v381_v35 = vpop.f32.mrf.mxu2  ;;  %615 = vrcp.f32 %v220_v33  ;;  %v233_v54 = vand.u32 2147483647, %v220_v33  ;;  %v235_v55 = vand.u32 2147483648, %v220_v33  ;;  %vm229_vm4 = vweird.f32 %v220_v33 }
 0x19b   :  { %v404_v36 = vpop.f32.mrf.mxu3  ;;  %617 = vrcp.f32 %v221_v34  ;;  %v382_v37 = vadd.f32 %v381_v35, %v95_v62  ;;  %v248_v57 = vand.u32 2147483647, %v221_v34  ;;  %v250_v58 = vand.u32 2147483648, %v221_v34 }
 0x19c   :  { %v405_v38 = vadd.f32 %v404_v36, %v95_v62  ;;  %vm244_vm6 = vweird.f32 %v221_v34  ;;  %vm234_vm8 = vcmp.eq.f32.partialorder %v233_v54, 8.507059e+37  ;;  %v236_v8 = vor.u32 1.1754944e-38, %v235_v55 }
 0x19d   :  { %v452_v41 = vadd.f32 %v445_v40, %v382_v37  ;;  %vm249_vm9 = vcmp.eq.f32.partialorder %v248_v57, 8.507059e+37  ;;  %v251_v15 = vor.u32 1.1754944e-38, %v250_v58 }
 0x19e   :  { %v453_v42 = vadd.f32 %v445_v40, %v405_v38 }
 0x19f   :  { %v590_v44 = vmul.f32 -1.442695, %v452_v41 }
 0x1a0   :  { %v616_v43 = vpop.eup %615  ;;  %v591_v45 = vmul.f32 -1.442695, %v453_v42 }
 0x1a1   :  { %v618_v46 = vpop.eup %617  ;;  %v225_v49 = vmul.f32 %v616_v43, %v220_v33  ;;  %619 = vpow2.f32 %v590_v44  ;;  %vm230_vm3 = vweird.f32 %v616_v43 }
 0x1a2   :  { %v240_v51 = vmul.f32 %v618_v46, %v221_v34  ;;  %621 = vpow2.f32 %v591_v45  ;;  %vm245_vm5 = vweird.f32 %v618_v46  ;;  %vm231_vm7 = vmor %vm229_vm4, %vm230_vm3  ;;  %v384_v27 = vpop.f32.mrf.mxu2 }
 0x1a3   :  { %v226_v53 = vsub.f32 1.0, %v225_v49  ;;  %vm246_vm10 = vmor %vm244_vm6, %vm245_vm5  ;;  %v385_v34 = vadd.f32 %v384_v27, %v843_v61  ;;  %v407_v35 = vpop.f32.mrf.mxu3 }
 0x1a4   :  { %v241_v56 = vsub.f32 1.0, %v240_v51  ;;  %v202_v59 = vpop.permute.xlu0 %201 }
 0x1a5   :  { %v227_v60 = vmul.f32 %v616_v43, %v226_v53  ;;  %v206_v62 = vadd.f32 %v202_v59, %v130_v50  ;;  %v207_v39 = vadd.f32 %v202_v59, %v153_v52 }
 0x1a6   :  { %v242_v63 = vmul.f32 %v618_v46, %v241_v56 }
 0x1a7   :  { %v228_v0 = vadd.f32 %v616_v43, %v227_v60  ;;  %v574_v1 = vmul.f32 -1.442695, %v206_v62  ;;  %v575_v47 = vmul.f32 -1.442695, %v207_v39  ;;  %v620_v4 = vpop.eup %619 }
 0x1a8   :  { %v243_v12 = vadd.f32 %v618_v46, %v242_v63  ;;  %v622_v48 = vpop.eup %621  ;;  %v468_v20 = vadd.f32 1.0, %v620_v4 }
 0x1a9   :  { %v232_v13 = vsel %vm231_vm7, %v616_v43, %v228_v0  ;;  %623 = vpow2.f32 %v574_v1  ;;  %v853_v26 = vadd.f32 1.0, %v622_v48  ;;  %v408_v43 = vadd.f32 %v407_v35, %v843_v61 }
 0x1aa   :  { %v237_v23 = vsel %vm234_vm8, %v236_v8, %v232_v13  ;;  %v247_v14 = vsel %vm246_vm10, %v618_v46, %v243_v12  ;;  %625 = vpow2.f32 %v575_v47  ;;  %v481_v61 = vand.u32 2147483647, %v468_v20 }
 0x1ab   :  { %v252_v28 = vsel %vm249_vm9, %v251_v15, %v247_v14  ;;  %v284_v29 = vmul.f32 2.0, %v237_v23  ;;  %627 = vrcp.f32 %v468_v20  ;;  %v483_v52 = vand.u32 2147483648, %v468_v20 }
 0x1ac   :  { %v285_v30 = vmul.f32 2.0, %v252_v28  ;;  %629 = vrcp.f32 %v853_v26  ;;  %v450_v31 = vpop.permute.xlu1 %449  ;;  %v496_v53 = vand.u32 2147483647, %v853_v26  ;;  %vm477_vm11 = vweird.f32 %v468_v20 }
 0x1ad   :  { %v288_v32 = vmul.f32 %v284_v29, %v698_v7  ;;  %v296_v33 = vsub.f32 2.0, %v284_v29  ;;  %v454_v41 = vadd.f32 %v450_v31, %v385_v34  ;;  %v498_v55 = vand.u32 2147483648, %v853_v26 }
 0x1ae   :  { %v289_v36 = vmul.f32 %v285_v30, %v710_v10  ;;  %v297_v37 = vsub.f32 2.0, %v285_v30  ;;  %vm883_vm13 = vcmp.eq.f32.partialorder %v481_v61, 8.507059e+37  ;;  %vm492_vm14 = vweird.f32 %v853_v26 }
 0x1af   :  { %v624_v38 = vpop.eup %623  ;;  %292 = vst [vmem:[%s962_s3] sm:$0xff] %v288_v32  ;;  %v300_v40 = vmul.f32 %v296_v33, %v705_v9  ;;  %v592_v49 = vmul.f32 -1.442695, %v454_v41  ;;  %v484_v39 = vor.u32 1.1754944e-38, %v483_v52  ;;  %vm888_vm0 = vcmp.eq.f32.partialorder %v496_v53, 8.507059e+37 }
 0x1b0   :  { %v626_v42 = vpop.eup %625  ;;  %293 = vst [vmem:[%s962_s3 + $0x8] sm:$0xff] %v289_v36  ;;  %v301_v7 = vmul.f32 %v297_v37, %v715_v11  ;;  %v868_v44 = vadd.f32 1.0, %v624_v38  ;;  %v455_v11 = vadd.f32 %v450_v31, %v408_v43  ;;  %v499_v1 = vor.u32 1.1754944e-38, %v498_v55 }
 0x1b1   :  { %v628_v10 = vpop.eup %627  ;;  %304 = vst [vmem:[%s963_s4] sm:$0xff] %v300_v40  ;;  %v873_v45 = vadd.f32 1.0, %v626_v42 }
 0x1b2   :  { %v630_v9 = vpop.eup %629  ;;  %305 = vst [vmem:[%s963_s4 + $0x8] sm:$0xff] %v301_v7  ;;  %v473_v46 = vmul.f32 %v628_v10, %v468_v20  ;;  %631 = vrcp.f32 %v868_v44  ;;  %vm478_vm12 = vweird.f32 %v628_v10  ;;  %v593_v57 = vmul.f32 -1.442695, %v455_v11 }
 0x1b3   :  { %v488_v50 = vmul.f32 %v630_v9, %v853_v26  ;;  %633 = vrcp.f32 %v873_v45  ;;  %vm493_vm15 = vweird.f32 %v630_v9  ;;  %vm479_vm1 = vmor %vm477_vm11, %vm478_vm12  ;;  %vm259_vm2 = vweird.f32 %v868_v44 }
 0x1b4   :  { %v474_v51 = vsub.f32 1.0, %v473_v46  ;;  %635 = vpow2.f32 %v592_v49  ;;  %vm494_vm3 = vmor %vm492_vm14, %vm493_vm15  ;;  %v263_v12 = vand.u32 2147483647, %v868_v44  ;;  %v265_v48 = vand.u32 2147483648, %v868_v44 }
 0x1b5   :  { %v489_v54 = vsub.f32 1.0, %v488_v50  ;;  %637 = vpow2.f32 %v593_v57  ;;  %vm274_vm4 = vweird.f32 %v873_v45  ;;  %v278_v28 = vand.u32 2147483647, %v873_v45 }
 0x1b6   :  { %v475_v56 = vmul.f32 %v628_v10, %v474_v51  ;;  %v280_v36 = vand.u32 2147483648, %v873_v45  ;;  %vm264_vm8 = vcmp.eq.f32.partialorder %v263_v12, 8.507059e+37 }
 0x1b7   :  { %v490_v59 = vmul.f32 %v630_v9, %v489_v54  ;;  %vm279_vm10 = vcmp.eq.f32.partialorder %v278_v28, 8.507059e+37 }
 0x1b8   :  { %v632_v60 = vpop.eup %631  ;;  %v476_v62 = vadd.f32 %v628_v10, %v475_v56 }
 0x1b9   :  { %v491_v0 = vadd.f32 %v630_v9, %v490_v59  ;;  %v255_v47 = vmul.f32 %v632_v60, %v868_v44  ;;  %v634_v4 = vpop.eup %633  ;;  %vm260_vm5 = vweird.f32 %v632_v60  ;;  %v281_v44 = vor.u32 1.1754944e-38, %v280_v36 }
 0x1ba   :  { %v480_v8 = vsel %vm479_vm1, %v628_v10, %v476_v62  ;;  %v270_v23 = vmul.f32 %v634_v4, %v873_v45  ;;  %v636_v14 = vpop.eup %635  ;;  %vm275_vm6 = vweird.f32 %v634_v4  ;;  %vm261_vm7 = vmor %vm259_vm2, %vm260_vm5 }
 0x1bb   :  { %v485_v13 = vsel %vm883_vm13, %v484_v39, %v480_v8  ;;  %v495_v15 = vsel %vm494_vm3, %v630_v9, %v491_v0  ;;  %v256_v20 = vsub.f32 1.0, %v255_v47  ;;  %v470_v32 = vadd.f32 1.0, %v636_v14  ;;  %v638_v33 = vpop.eup %637  ;;  %vm276_vm9 = vmor %vm274_vm4, %vm275_vm6 }
 0x1bc   :  { %v532_v26 = vmul.f32 2.0, %v485_v13  ;;  %v500_v27 = vsel %vm888_vm0, %v499_v1, %v495_v15  ;;  %v271_v31 = vsub.f32 1.0, %v270_v23  ;;  %v471_v7 = vadd.f32 1.0, %v638_v33 }
 0x1bd   :  { %v533_v29 = vmul.f32 2.0, %v500_v27  ;;  %v257_v30 = vmul.f32 %v632_v60, %v256_v20  ;;  %639 = vrcp.f32 %v470_v32  ;;  %v511_v57 = vand.u32 2147483647, %v470_v32 }
 0x1be   :  { %v536_v34 = vmul.f32 %v755_v21, %v532_v26  ;;  %v545_v35 = vsub.f32 2.0, %v532_v26  ;;  %v272_v41 = vmul.f32 %v634_v4, %v271_v31  ;;  %v266_v21 = vor.u32 1.1754944e-38, %v265_v48 }
 0x1bf   :  { %v537_v37 = vmul.f32 %v760_v22, %v533_v29  ;;  %v546_v38 = vsub.f32 2.0, %v533_v29  ;;  %v258_v40 = vadd.f32 %v632_v60, %v257_v30  ;;  %641 = vrcp.f32 %v471_v7 }
 0x1c0   :  { %594 = vst [vmem:[%s962_s3 + $0x20] sm:$0xff] %v536_v34  ;;  %v549_v42 = vmul.f32 %v767_v24, %v545_v35  ;;  %v273_v10 = vadd.f32 %v634_v4, %v272_v41  ;;  %vm507_vm12 = vweird.f32 %v470_v32  ;;  %v528_v59 = vand.u32 2147483648, %v471_v7 }
 0x1c1   :  { %595 = vst [vmem:[%s962_s3 + $0x28] sm:$0xff] %v537_v37  ;;  %v550_v22 = vmul.f32 %v772_v25, %v546_v38  ;;  %v262_v43 = vsel %vm261_vm7, %v632_v60, %v258_v40  ;;  %vm512_vm15 = vcmp.eq.f32.partialorder %v511_v57, 8.507059e+37  ;;  %vm522_vm0 = vweird.f32 %v471_v7 }
 0x1c2   :  { %598 = vst [vmem:[%s963_s4 + $0x20] sm:$0xff] %v549_v42  ;;  %v267_v24 = vsel %vm264_vm8, %v266_v21, %v262_v43  ;;  %v277_v9 = vsel %vm276_vm9, %v634_v4, %v273_v10  ;;  %v529_v47 = vor.u32 1.1754944e-38, %v528_v59 }
 0x1c3   :  { %599 = vst [vmem:[%s963_s4 + $0x28] sm:$0xff] %v550_v22  ;;  %v286_v25 = vmul.f32 2.0, %v267_v24  ;;  %v282_v46 = vsel %vm279_vm10, %v281_v44, %v277_v9  ;;  %v640_v50 = vpop.eup %639 }
 0x1c4   :  { %v287_v11 = vmul.f32 2.0, %v282_v46  ;;  %v503_v53 = vmul.f32 %v640_v50, %v470_v32  ;;  %vm508_vm11 = vweird.f32 %v640_v50 }
 0x1c5   :  { %v290_v49 = vmul.f32 %v286_v25, %v676_v2  ;;  %v298_v61 = vsub.f32 2.0, %v286_v25  ;;  %v642_v54 = vpop.eup %641  ;;  %vm509_vm14 = vmor %vm507_vm12, %vm508_vm11 }
 0x1c6   :  { %v291_v51 = vmul.f32 %v287_v11, %v688_v5  ;;  %v299_v45 = vsub.f32 2.0, %v287_v11  ;;  %v504_v2 = vsub.f32 1.0, %v503_v53  ;;  %v518_v56 = vmul.f32 %v642_v54, %v471_v7 }
 0x1c7   :  { %294 = vst [vmem:[%s962_s3 + $0x10] sm:$0xff] %v290_v49  ;;  %v302_v52 = vmul.f32 %v298_v61, %v681_v3  ;;  %v513_v5 = vand.u32 2147483648, %v470_v32  ;;  %vm523_vm13 = vweird.f32 %v642_v54 }
 0x1c8   :  { %295 = vst [vmem:[%s962_s3 + $0x18] sm:$0xff] %v291_v51  ;;  %v303_v55 = vmul.f32 %v299_v45, %v693_v6  ;;  %v505_v3 = vmul.f32 %v640_v50, %v504_v2  ;;  %v519_v58 = vsub.f32 1.0, %v518_v56  ;;  %v526_v6 = vand.u32 2147483647, %v471_v7  ;;  %vm524_vm1 = vmor %vm522_vm0, %vm523_vm13 }
 0x1c9   :  { %306 = vst [vmem:[%s963_s4 + $0x10] sm:$0xff] %v302_v52  ;;  %v514_v39 = vor.u32 1.1754944e-38, %v513_v5 }
 0x1ca   :  { %307 = vst [vmem:[%s963_s4 + $0x18] sm:$0xff] %v303_v55  ;;  %v506_v60 = vadd.f32 %v640_v50, %v505_v3  ;;  %v520_v62 = vmul.f32 %v642_v54, %v519_v58  ;;  %vm527_vm2 = vcmp.eq.f32.partialorder %v526_v6, 8.507059e+37 }
 0x1cc   :  { %v510_v63 = vsel %vm509_vm14, %v640_v50, %v506_v60  ;;  %v521_v0 = vadd.f32 %v642_v54, %v520_v62 }
 0x1cd   :  { %v515_v1 = vsel %vm512_vm15, %v514_v39, %v510_v63 }
 0x1ce   :  { %v525_v4 = vsel %vm524_vm1, %v642_v54, %v521_v0  ;;  %v534_v8 = vmul.f32 2.0, %v515_v1 }
 0x1cf   :  { %v530_v12 = vsel %vm527_vm2, %v529_v47, %v525_v4 }
 0x1d0   :  { %v535_v48 = vmul.f32 2.0, %v530_v12  ;;  %v538_v13 = vmul.f32 %v733_v16, %v534_v8  ;;  %v547_v15 = vsub.f32 2.0, %v534_v8 }
 0x1d2   :  { %v539_v20 = vmul.f32 %v738_v17, %v535_v48  ;;  %596 = vst [vmem:[%s962_s3 + $0x30] sm:$0xff] %v538_v13  ;;  %v548_v23 = vsub.f32 2.0, %v535_v48  ;;  %v551_v14 = vmul.f32 %v743_v18, %v547_v15 }
 0x1d4   :  { %597 = vst [vmem:[%s962_s3 + $0x38] sm:$0xff] %v539_v20  ;;  %v552_v26 = vmul.f32 %v748_v19, %v548_v23 }
 0x1d5   :  { %600 = vst [vmem:[%s963_s4 + $0x30] sm:$0xff] %v551_v14 }
 0x1d6   :  { %601 = vst [vmem:[%s963_s4 + $0x38] sm:$0xff] %v552_v26 }

</bundles_post_ra>
